<compile_context>
chip_gen: v6e
topology: v6e:2x2x1
jax: 0.10.0
libtpu: 0.0.40
codegen_flags: <defaults>
</compile_context>

<pallas_src>
import math
import jax
import jax.numpy as jnp
from jax.experimental import pallas as pl
from jax.experimental.pallas import tpu as pltpu


def _round_up(n, m):
    return ((n + m - 1) // m) * m


# --------------------------- kernel bodies ---------------------------------

def _kernel_single_k(x_ref, w_ref, b_ref, o_ref):
    # Single K step: write (x @ W + b) straight to the output block.
    acc = jnp.dot(x_ref[...], w_ref[...], preferred_element_type=jnp.float32)
    acc = acc + b_ref[...].astype(jnp.float32)
    o_ref[...] = acc.astype(o_ref.dtype)


def _kernel_multi_k_f32(x_ref, w_ref, b_ref, o_ref):
    # Multi-K, f32 output: accumulate directly in the resident output block
    # (its block index is constant across the k axis), bias folded into k==0.
    k = pl.program_id(2)

    @pl.when(k == 0)
    def _():
        o_ref[...] = jnp.broadcast_to(b_ref[...].astype(jnp.float32), o_ref.shape)

    o_ref[...] += jnp.dot(x_ref[...], w_ref[...],
                          preferred_element_type=jnp.float32)


def _kernel_multi_k_scratch(x_ref, w_ref, b_ref, o_ref, acc_ref):
    # Multi-K with sub-f32 output dtype: keep an f32 accumulator scratch.
    k = pl.program_id(2)

    @pl.when(k == 0)
    def _():
        acc_ref[...] = jnp.broadcast_to(b_ref[...].astype(jnp.float32),
                                        acc_ref.shape)

    acc_ref[...] += jnp.dot(x_ref[...], w_ref[...],
                            preferred_element_type=jnp.float32)

    @pl.when(k == pl.num_programs(2) - 1)
    def _():
        o_ref[...] = acc_ref[...].astype(o_ref.dtype)


# ----------------------------- wrapper --------------------------------------

def spatial_expand(x, weight, bias, out_channels, spatial_dims):
    """x: (B, Cin); weight: (Cin, out*Y*X); bias: (out*Y*X,) -> (B, out, Y, X)."""
    B, Cin = x.shape
    Y, X = spatial_dims
    F = out_channels * Y * X
    assert weight.shape == (Cin, F)
    assert bias.shape == (F,)

    out_dtype = x.dtype
    x_itemsize = jnp.dtype(x.dtype).itemsize
    w_itemsize = jnp.dtype(weight.dtype).itemsize
    o_itemsize = jnp.dtype(out_dtype).itemsize
    b2d = bias.reshape(1, F)

    # ---- M tile: single block for small batches, 256-row tiles otherwise.
    TM = B if B <= 256 else 256
    num_i = pl.cdiv(B, TM)

    # ---- K tile: single step whenever Cin fits (the common case); otherwise
    # pick a 128-multiple that divides Cin, falling back to zero-padding K
    # only (the only padding required for correctness).
    if Cin <= 2048:
        TK = Cin
    else:
        TK = next((t for t in (2048, 1024, 512, 256, 128) if Cin % t == 0), 512)
    k_pad = (_round_up(Cin, TK) - Cin) if (Cin % TK) else 0
    num_k = (Cin + k_pad) // TK

    x_p, w_p = x, weight
    if k_pad:  # rare path: Cin > 2048 and not a multiple of 128
        x_p = jnp.pad(x, ((0, 0), (0, k_pad)))
        w_p = jnp.pad(weight, ((0, k_pad), (0, 0)))

    # ---- N tile: lane-aligned, sized for ~2 MiB weight DMAs, bounded by F.
    tn_target = _round_up(max(1, (2 * 1024 * 1024) // max(TK * w_itemsize, 1)), 256)
    TN = min(max(256, min(2048, tn_target)), _round_up(F, 128))
    # v7x has 2 TensorCores: make sure some parallel axis has >= 2 tiles when
    # F is big enough to split (no effect on v5e/v6e correctness or layout).
    if num_i == 1 and pl.cdiv(F, TN) == 1 and F >= 512:
        TN = _round_up(pl.cdiv(F, 2), 256)
    num_j = pl.cdiv(F, TN)

    cost = pl.CostEstimate(
        flops=2 * B * Cin * F,
        transcendentals=0,
        bytes_accessed=Cin * F * w_itemsize + B * Cin * x_itemsize
        + B * F * o_itemsize,
    )

    if num_k == 1:
        # Pick grid order so the operand whose block index is constant across
        # the inner axis (and thus DMA'd only once) is the bigger byte stream.
        x_bytes = B * Cin * x_itemsize
        w_bytes = Cin * F * w_itemsize
        cost_j_outer = w_bytes + x_bytes * num_j   # weight streamed once
        cost_i_outer = x_bytes + w_bytes * num_i   # x streamed once
        if cost_j_outer <= cost_i_outer:
            grid = (num_j, num_i)
            x_map = lambda j, i: (i, 0)
            w_map = lambda j, i: (0, j)
            b_map = lambda j, i: (0, j)
            o_map = lambda j, i: (i, j)
        else:
            grid = (num_i, num_j)
            x_map = lambda i, j: (i, 0)
            w_map = lambda i, j: (0, j)
            b_map = lambda i, j: (0, j)
            o_map = lambda i, j: (i, j)

        out_flat = pl.pallas_call(
            _kernel_single_k,
            out_shape=jax.ShapeDtypeStruct((B, F), out_dtype),
            grid=grid,
            in_specs=[
                pl.BlockSpec((TM, TK), x_map),   # x
                pl.BlockSpec((TK, TN), w_map),   # weight
                pl.BlockSpec((1, TN), b_map),    # bias
            ],
            out_specs=pl.BlockSpec((TM, TN), o_map),
            compiler_params=pltpu.CompilerParams(
                dimension_semantics=("parallel", "parallel")),
            cost_estimate=cost,
        )(x_p, w_p, b2d)
    else:
        f32_out = jnp.dtype(out_dtype) == jnp.dtype(jnp.float32)
        kernel = _kernel_multi_k_f32 if f32_out else _kernel_multi_k_scratch
        scratch = [] if f32_out else [pltpu.VMEM((TM, TN), jnp.float32)]
        out_flat = pl.pallas_call(
            kernel,
            out_shape=jax.ShapeDtypeStruct((B, F), out_dtype),
            grid=(num_i, num_j, num_k),
            in_specs=[
                pl.BlockSpec((TM, TK), lambda i, j, k: (i, k)),   # x
                pl.BlockSpec((TK, TN), lambda i, j, k: (k, j)),   # weight
                pl.BlockSpec((1, TN), lambda i, j, k: (0, j)),    # bias
            ],
            out_specs=pl.BlockSpec((TM, TN), lambda i, j, k: (i, j)),
            scratch_shapes=scratch,
            compiler_params=pltpu.CompilerParams(
                dimension_semantics=("parallel", "parallel", "arbitrary")),
            cost_estimate=cost,
        )(x_p, w_p, b2d)

    # Unflatten: (B, out*Y*X) -> (B, out_channels, Y, X)   (contiguous reshape)
    return out_flat.reshape(B, out_channels, Y, X)


if __name__ == "__main__":
    # Small shapes consistent with the module's docstring example.
    B = 8
    in_channels = 8
    out_channels = 12
    spatial_dims = (4, 4)
    F = out_channels * spatial_dims[0] * spatial_dims[1]

    key = jax.random.PRNGKey(0)
    kx, kw, kb = jax.random.split(key, 3)

    # Deterministic parameter init mimicking nn.Linear default
    # (uniform in [-1/sqrt(in_channels), 1/sqrt(in_channels)]).
    bound = 1.0 / math.sqrt(in_channels)
    weight = jax.random.uniform(kw, (in_channels, F), jnp.float32, -bound, bound)
    bias = jax.random.uniform(kb, (F,), jnp.float32, -bound, bound)

    x = jax.random.normal(kx, (B, in_channels), jnp.float32)

    out = spatial_expand(x, weight, bias, out_channels, spatial_dims)
    out = jax.block_until_ready(out)

    # Sanity check vs plain-JAX reference.
    ref = (x @ weight + bias).reshape(B, out_channels, *spatial_dims)
    assert out.shape == (B, out_channels, spatial_dims[0], spatial_dims[1])
    assert jnp.allclose(out, ref, atol=1e-5, rtol=1e-5)

    print("KERNEL_OK")
</pallas_src>

<mosaic_0001>
module attributes {stable_mosaic.version = 11 : i64} {
  func.func @_kernel_single_k(%arg0: i32, %arg1: i32, %arg2: memref<8x8xf32, #tpu.memory_space<vmem>>, %arg3: memref<8x256xf32, #tpu.memory_space<vmem>>, %arg4: memref<1x256xf32, #tpu.memory_space<vmem>>, %arg5: memref<8x256xf32, #tpu.memory_space<vmem>>) attributes {dimension_semantics = [#tpu.dimension_semantics<parallel>, #tpu.dimension_semantics<parallel>], iteration_bounds = array<i64: 1, 1>, scalar_prefetch = 0 : i64, scratch_operands = 0 : i64, tpu.core_type = #tpu.core_type<tc>, window_params = [{transform_indices = @transform_0, window_bounds = array<i64: 8, 8>}, {transform_indices = @transform_1, window_bounds = array<i64: 8, 256>}, {transform_indices = @transform_2, window_bounds = array<i64: 1, 256>}, {transform_indices = @transform_3, window_bounds = array<i64: 8, 256>}]} {
    %c0 = arith.constant 0 : index
    %c0_0 = arith.constant 0 : index
    %0 = vector.load %arg2[%c0, %c0_0] : memref<8x8xf32, #tpu.memory_space<vmem>>, vector<8x8xf32>
    %c0_1 = arith.constant 0 : index
    %c0_2 = arith.constant 0 : index
    %1 = vector.load %arg3[%c0_1, %c0_2] : memref<8x256xf32, #tpu.memory_space<vmem>>, vector<8x256xf32>
    %cst = arith.constant dense<0.000000e+00> : vector<8x256xf32>
    %2 = tpu.matmul %0, %1, %cst {dimension_numbers = #tpu.dot_dimension_numbers<[1], [0], [0], [1], [0, 0, 1, 1], [], []>} : vector<8x8xf32>, vector<8x256xf32>, vector<8x256xf32> -> vector<8x256xf32>
    %c0_3 = arith.constant 0 : index
    %c0_4 = arith.constant 0 : index
    %3 = vector.load %arg4[%c0_3, %c0_4] : memref<1x256xf32, #tpu.memory_space<vmem>>, vector<1x256xf32>
    %4 = vector.broadcast %3 : vector<1x256xf32> to vector<8x256xf32>
    %5 = arith.addf %2, %4 : vector<8x256xf32>
    %c0_5 = arith.constant 0 : index
    %c0_6 = arith.constant 0 : index
    %6 = vector.load %arg5[%c0_5, %c0_6] : memref<8x256xf32, #tpu.memory_space<vmem>>, vector<8x256xf32>
    tpu.vector_store %arg5[%c0_5, %c0_6], %5 {strides = array<i32>} : memref<8x256xf32, #tpu.memory_space<vmem>>, vector<8x256xf32>,
    return
  }
  func.func @transform_0(%arg0: i32, %arg1: i32) -> (i32, i32) {
    %c0_i32 = arith.constant 0 : i32
    %c0_i32_0 = arith.constant 0 : i32
    return %arg1, %c0_i32 : i32, i32
  }
  func.func @transform_1(%arg0: i32, %arg1: i32) -> (i32, i32) {
    %c0_i32 = arith.constant 0 : i32
    %c0_i32_0 = arith.constant 0 : i32
    return %c0_i32, %arg0 : i32, i32
  }
  func.func @transform_2(%arg0: i32, %arg1: i32) -> (i32, i32) {
    %c0_i32 = arith.constant 0 : i32
    %c0_i32_0 = arith.constant 0 : i32
    return %c0_i32, %arg0 : i32, i32
  }
  func.func @transform_3(%arg0: i32, %arg1: i32) -> (i32, i32) {
    %c0_i32 = arith.constant 0 : i32
    return %arg1, %arg0 : i32, i32
  }
}

</mosaic_0001>

<bundles_post_ra>
// kernel: tpu_custom_call.1
= control target key start
LH: loop header
LB: loop body
LE: loop exit
PB: predicated region body
PF: predicated region fallthrough
CT: control target
= control target key end

     0   :  { %8 = vsyncpa [#allocation3], 0  ;;  %s254_s0 = inlined_call_operand.hbm [shape: f32[8,8], index: 0, kind: input, shape index: {}]   ;;  %s255_s1 = inlined_call_operand.hbm [shape: f32[8,192], index: 1, kind: input, shape index: {}]   ;;  %s256_s2 = inlined_call_operand.vmem [shape: f32[1,192], index: 2, kind: input, shape index: {}]   ;;  %s257_s3 = inlined_call_operand.hbm [shape: f32[8,192], index: 3, kind: output, shape index: {}]  }
   0x1   :  { %9 = vsyncpa [#allocation6], 0 }
   0x2   :  { %10 = vsyncpa [#allocation4], 0  ;;  %s218_s12 = smov [#allocation2]   ;;  %s219_s14 = smov [#allocation5]  }
   0x3   :  { %s17_s13 = sshll.u32 %s218_s12, 4  ;;  %s27_s15 = sshll.u32 %s219_s14, 4  ;;  %s18_s13 = int_to_ptr.vmem [resolvable:$true] %s17_s13  ;;  %s28_s15 = int_to_ptr.vmem [resolvable:$true] %s27_s15 }
   0x4   :  { %s160_s16 = scalar_lea.vmem %s18_s13, 128  ;;  %p165_p1 = scmp.lt.s32.totalorder %s18_s13, %s18_s13 }
   0x5   :  { %p161_p0 = scmp.ne.s32.totalorder %s18_s13, %s160_s16  ;;  %p166_p2 = scmp.lt.s32.totalorder %s160_s16, %s160_s16 }
   0x7   :  { %p167_p3 = por %p166_p2, %p165_p1 }
   0x9   :  { %p168_p4 = pnand %p167_p3, %p161_p0 }
   0xb   :  { %171 = shalt.err (!%p168_p4)
}
   0xc   :  { %20 = dma.hbm_to_vmem [thread:$0]  %s254_s0, 128, %s18_s13, [#allocation3]  }
   0xd   :  { %s180_s19 = scalar_lea.vmem %s28_s15, 256  ;;  %p185_p6 = scmp.lt.s32.totalorder %s28_s15, %s28_s15 }
   0xe   :  { %p181_p5 = scmp.ne.s32.totalorder %s28_s15, %s180_s19  ;;  %p186_p7 = scmp.lt.s32.totalorder %s180_s19, %s180_s19 }
  0x10   :  { %p187_p8 = por %p186_p7, %p185_p6 }
  0x12   :  { %p188_p9 = pnand %p187_p8, %p181_p5 }
  0x14   :  { %191 = shalt.err (!%p188_p9)
}
  0x15   :  { %30 = dma.hbm_to_vmem [thread:$0]  %s255_s1, 256, %s28_s15, [#allocation6]  }
  0x16   :  { %212 = dma.done.wait [#allocation3], 128  }
  0x17   :  { %213 = vsyncadd [#allocation3], 4294967168 }
  0x18   :  { %214 = dma.done.wait [#allocation6], 256  }
  0x19   :  { %215 = vsyncadd [#allocation6], 4294967040  ;;  %v220_v0 = vmov 0.0   ;;  %v41_v1 = vld [vmem:[#allocation5 + $0x8] sm:$0xff]  ;;  %v40_v2 = vld [vmem:[#allocation5] sm:$0xff]  ;;  %vm54_vm0 = vcmask 64512   ;;  %v44_v4 = vlaneseq }
  0x1a   :  { %122 = vmatprep.mubr.f32.mxu0 %v220_v0  ;;  %v39_v3 = vld [vmem:[#allocation2] sm:$0xff]  ;;  %88 = vmatprep.subr.mxu0 %v41_v1  ;;  %s221_s1 = smov [#allocation7]  }
  0x1b   :  { %89 = vmatpush1.msra.mxu0 %v40_v2  ;;  %v45_v5 = vshrl.u32 %v44_v4, 7  ;;  %v42_v7 = vld [vmem:[%s256_s2] sm:$0x3]  ;;  %s137_s23 = sshll.u32 %s221_s1, 4  ;;  %s138_s23 = int_to_ptr.vmem [resolvable:$true] %s137_s23 }
  0x1c   :  { %147 = vmatmul.mubr.msk.f32.vlgmr.msra.gmra.mxu0 %vm54_vm0, %v39_v3  ;;  %s192_s24 = scalar_lea.vmem %s138_s23, 256  ;;  %p197_p11 = scmp.lt.s32.totalorder %s138_s23, %s138_s23 }
  0x1d   :  { %v46_v6 = vsub.s32 0, %v45_v5  ;;  %v50_v8 = vsub.s32 1, %v45_v5  ;;  %p193_p10 = scmp.ne.s32.totalorder %s138_s23, %s192_s24  ;;  %p198_p12 = scmp.lt.s32.totalorder %s192_s24, %s192_s24 }
  0x1f   :  { %v47_v9 = vrot.slane %v42_v7, %v46_v6  ;;  %v51_v10 = vrot.slane %v42_v7, %v50_v8  ;;  %p199_p13 = por %p198_p12, %p197_p11 }
  0x21   :  { %p200_p0 = pnand %p199_p13, %p193_p10 }
  0xdc   :  { %v124_v11 = vpop.f32.mrf.mxu0 }
  0xdd   :  { %v125_v12 = vadd.f32 %v124_v11, %v47_v9 }
  0xde   :  { %v126_v13 = vpop.f32.mrf.mxu0 }
  0xdf   :  { %129 = vst [vmem:[#allocation7] sm:$0xff] %v125_v12  ;;  %v127_v14 = vadd.f32 %v126_v13, %v51_v10 }
  0xe1   :  { %130 = vst [vmem:[#allocation7 + $0x8] sm:$0xff] %v127_v14 }
  0xe2   :  { %203 = shalt.err (!%p200_p0)
}
  0xe3   :  { %140 = dma.vmem_to_hbm [thread:$0]  %s138_s23, 256, %s257_s3, [#allocation4]  }
  0xe4   :  { %216 = dma.done.wait [#allocation4], 256  }
  0xe5   :  { %217 = vsyncadd [#allocation4], 4294967040 }
  0xe6   :  { %144 = vsyncpa [#allocation3], 1 }
  0xe7   :  { %145 = vsyncpa [#allocation6], 1 }
  0xe8   :  { %146 = vsyncpa [#allocation4], 1 }

</bundles_post_ra>
